<compile_context>
chip_gen: v7x
topology: tpu7x:2x2x1
jax: 0.10.0
libtpu: 0.0.40
codegen_flags: <defaults>
</compile_context>

<pallas_src>
import functools
import math

import jax
import jax.numpy as jnp
from jax.experimental import pallas as pl
from jax.experimental.pallas import tpu as pltpu


def _round_up(a: int, b: int) -> int:
    return (a + b - 1) // b * b


def _sublane(dtype) -> int:
    """Minimum second-to-last block-dim multiple for this dtype (sublane packing)."""
    return 32 // jnp.dtype(dtype).itemsize  # f32 -> 8, bf16 -> 16, int8/fp8 -> 32


# Tile / VMEM budgets chosen to be safe across v5e / v6e / v7x (v7x: 64 MiB physical).
_TM_CAP = 256
_TN_CAP_16BIT = 1024
_TN_CAP_32BIT = 512
_TILE_VMEM_BUDGET = 40 * 1024 * 1024
_VMEM_LIMIT_CAP = 56 * 1024 * 1024


def _estimate_tile_vmem(tm, tn, D, x_b, w_b, b_b, ln_b, o_b) -> int:
    """Double-buffered VMEM working-set estimate for one grid step (bytes)."""
    act = 2 * tm * D * x_b          # activation tile
    wgt = 2 * D * tn * w_b          # weight tile (streamed over the N axis)
    bias = 2 * 8 * tn * b_b         # bias tile (sublane-padded)
    lnp = 2 * 2 * 8 * D * ln_b      # gamma + beta (constant index; tiny)
    out = 2 * tm * tn * o_b         # output tile
    return act + wgt + bias + lnp + out


def _fused_ln_linear_kernel(x_ref, w_ref, b_ref, g_ref, beta_ref, o_ref, *,
                            apply_ln: bool, apply_relu: bool, eps: float):
    # x_ref: (tm, D), w_ref: (D, tn), b_ref: (1, tn),
    # g_ref/beta_ref: (1, D), o_ref: (tm, tn)
    if apply_ln:
        x = x_ref[...].astype(jnp.float32)
        mean = jnp.mean(x, axis=-1, keepdims=True)
        xc = x - mean
        var = jnp.mean(xc * xc, axis=-1, keepdims=True)
        x = xc * jax.lax.rsqrt(var + eps)
        x = x * g_ref[...].astype(jnp.float32) + beta_ref[...].astype(jnp.float32)
        x = x.astype(w_ref.dtype)
    else:
        # Skip the upcast entirely when dtypes already match (no-LN fast path).
        x = x_ref[...]
        if x.dtype != w_ref.dtype:
            x = x.astype(w_ref.dtype)
    # MXU matmul with f32 accumulation; bias-add / ReLU epilogue in f32.
    y = jnp.dot(x, w_ref[...], preferred_element_type=jnp.float32)
    y = y + b_ref[...].astype(jnp.float32)
    if apply_relu:
        y = jnp.maximum(y, 0.0)
    o_ref[...] = y.astype(o_ref.dtype)


def fused_linear_layer(x2d, w_t_pad, b_pad, g2d, beta2d, *,
                       apply_ln: bool, apply_relu: bool, eps: float = 1e-5):
    """Fused (LayerNorm +) Linear (+ ReLU).

    x2d:      (M, D)
    w_t_pad:  (D, N_pad)  -- weight pre-transposed, out dim zero-padded to 128k
    b_pad:    (1, N_pad)  -- f32 bias, zero-padded
    g2d/beta2d: (1, D)
    Returns (M, N_pad); caller slices to the true out dim.
    """
    M, D = x2d.shape
    D2, n_pad = w_t_pad.shape
    assert D == D2 and n_pad % 128 == 0

    x_b = jnp.dtype(x2d.dtype).itemsize
    w_b = jnp.dtype(w_t_pad.dtype).itemsize
    b_b = jnp.dtype(b_pad.dtype).itemsize
    ln_b = jnp.dtype(g2d.dtype).itemsize
    o_b = x_b  # output dtype follows the activation dtype

    # Dtype-aware sublane rounding (covers both the x block and the output block).
    sub = _sublane(x2d.dtype)

    # Balanced row tiles: avoid padding e.g. M=272 all the way up to 512.
    m_tiles = max(1, pl.cdiv(M, _TM_CAP))
    tm = min(_round_up(pl.cdiv(M, m_tiles), sub), _round_up(_TM_CAP, sub))

    # Column tile: large multiple of 128; 16-bit weights allow twice the width.
    tn_cap = _TN_CAP_16BIT if w_b <= 2 else _TN_CAP_32BIT
    tn = min(n_pad, tn_cap)

    # v7x has 2 TensorCores sharing the (parallel) grid: make sure a tiny-M call
    # still produces >=2 tiles when the output dim allows it.
    if pl.cdiv(M, tm) == 1 and pl.cdiv(n_pad, tn) == 1 and n_pad >= 256:
        tn = _round_up(n_pad // 2, 128)

    # Shrink tiles until the double-buffered working set fits the VMEM budget
    # (mandatory on v7x's 64 MiB; also keeps us clear of the scoped-VMEM default).
    while _estimate_tile_vmem(tm, tn, D, x_b, w_b, b_b, ln_b, o_b) > _TILE_VMEM_BUDGET:
        if tn > 128:
            tn = _round_up(max(128, tn // 2), 128)
        elif tm > sub:
            tm = _round_up(max(sub, tm // 2), sub)
        else:
            break

    m_pad = _round_up(M, tm)
    if m_pad != M:
        x2d = jnp.pad(x2d, ((0, m_pad - M), (0, 0)))

    # Make tn divide the padded out dim (padded weight columns are zero -> sliced off).
    n_full = _round_up(n_pad, tn)
    if n_full != n_pad:
        w_t_pad = jnp.pad(w_t_pad, ((0, 0), (0, n_full - n_pad)))
        b_pad = jnp.pad(b_pad, ((0, 0), (0, n_full - n_pad)))

    vmem_need = _estimate_tile_vmem(tm, tn, D, x_b, w_b, b_b, ln_b, o_b)
    vmem_limit = int(min(max(vmem_need * 3 // 2 + (2 << 20), 32 * 1024 * 1024),
                         _VMEM_LIMIT_CAP))

    kernel = functools.partial(_fused_ln_linear_kernel,
                               apply_ln=apply_ln, apply_relu=apply_relu, eps=eps)

    # NOTE: gamma/beta (and the x tile across the inner N axis) use constant /
    # repeated block indices, so Mosaic skips their re-DMA between grid steps;
    # they are tiny, so explicit single-buffering is not worth the risk here.
    out = pl.pallas_call(
        kernel,
        out_shape=jax.ShapeDtypeStruct((m_pad, n_full), x2d.dtype),
        grid_spec=pltpu.PrefetchScalarGridSpec(
            num_scalar_prefetch=0,
            grid=(m_pad // tm, n_full // tn),
            in_specs=[
                pl.BlockSpec((tm, D), lambda i, j: (i, 0)),     # activations (row tile)
                pl.BlockSpec((D, tn), lambda i, j: (0, j)),     # weight (column tile)
                pl.BlockSpec((1, tn), lambda i, j: (0, j)),     # bias (column tile)
                pl.BlockSpec((1, D), lambda i, j: (0, 0)),      # LN gamma (resident)
                pl.BlockSpec((1, D), lambda i, j: (0, 0)),      # LN beta (resident)
            ],
            out_specs=pl.BlockSpec((tm, tn), lambda i, j: (i, j)),  # lane-dense tile
        ),
        compiler_params=pltpu.CompilerParams(
            dimension_semantics=("parallel", "parallel"),
            vmem_limit_bytes=vmem_limit,
        ),
    )(x2d, w_t_pad, b_pad, g2d, beta2d)
    return out[:M, :n_pad]


class LinearLayer:
    """Pallas port of bm_detr LinearLayer (LayerNorm -> Dropout -> Linear -> ReLU)."""

    def __init__(self, in_hsz, out_hsz, layer_norm=True, dropout=0.1, relu=True,
                 *, key, dtype=jnp.float32, matmul_dtype=jnp.bfloat16):
        self.in_hsz = in_hsz
        self.out_hsz = out_hsz
        self.layer_norm = layer_norm
        self.relu = relu
        self.dropout = dropout
        self.eps = 1e-5  # nn.LayerNorm default
        self.matmul_dtype = matmul_dtype  # MXU-native bf16 by default; f32 acc kept

        kw, kb = jax.random.split(key)
        bound = 1.0 / math.sqrt(in_hsz)
        # nn.Linear-style init: W (out, in), b (out,)
        self.w = jax.random.uniform(kw, (out_hsz, in_hsz), dtype, -bound, bound)
        self.b = jax.random.uniform(kb, (out_hsz,), dtype, -bound, bound)
        # nn.LayerNorm default affine params
        self.gamma = jnp.ones((in_hsz,), dtype)
        self.beta = jnp.zeros((in_hsz,), dtype)

        # Pre-transpose W once to (in, out), cast to the matmul dtype, and zero-pad
        # the out dim to a multiple of 128 so kernel stores are lane-dense.
        self._n_pad = _round_up(out_hsz, 128)
        self._w_t_pad = (jnp.zeros((in_hsz, self._n_pad), matmul_dtype)
                         .at[:, :out_hsz].set(self.w.T.astype(matmul_dtype)))
        # Bias kept in f32 (epilogue is f32; negligible footprint).
        self._b_pad = (jnp.zeros((1, self._n_pad), jnp.float32)
                       .at[:, :out_hsz].set(self.b.astype(jnp.float32)))
        self._g2d = self.gamma.reshape(1, in_hsz)
        self._beta2d = self.beta.reshape(1, in_hsz)

    def __call__(self, x):
        """x: (N, L, D) or any (..., in_hsz)."""
        lead = x.shape[:-1]
        x2d = x.reshape(-1, self.in_hsz)
        # TODO(synk): nn.Dropout is identity here (inference mode); training-mode
        # dropout could be fused via pltpu.prng_seed + pltpu.stateful_bernoulli.
        y2d = fused_linear_layer(
            x2d, self._w_t_pad, self._b_pad, self._g2d, self._beta2d,
            apply_ln=self.layer_norm, apply_relu=self.relu, eps=self.eps)
        return y2d[:, :self.out_hsz].reshape(*lead, self.out_hsz)


def linear_layer_reference(x, layer: "LinearLayer", *, use_matmul_dtype: bool):
    """Plain-JAX reference matching the PyTorch forward (eval mode).

    With use_matmul_dtype=True, the matmul inputs are rounded to layer.matmul_dtype
    (as the kernel does), keeping f32 accumulation.
    """
    y = x.astype(jnp.float32)
    if layer.layer_norm:
        mean = jnp.mean(y, axis=-1, keepdims=True)
        var = jnp.mean((y - mean) ** 2, axis=-1, keepdims=True)
        y = (y - mean) * jax.lax.rsqrt(var + layer.eps) * layer.gamma + layer.beta
    if use_matmul_dtype:
        y = y.astype(layer.matmul_dtype).astype(jnp.float32)
        w = layer.w.astype(layer.matmul_dtype).astype(jnp.float32)
    else:
        w = layer.w.astype(jnp.float32)
    y = y @ w.T + layer.b.astype(jnp.float32)
    if layer.relu:
        y = jnp.maximum(y, 0.0)
    return y.astype(x.dtype)


if __name__ == "__main__":
    key = jax.random.PRNGKey(0)
    kx, k1, k2 = jax.random.split(key, 3)

    # (N, L, D) as the module's forward docstring implies; odd sizes to exercise padding.
    batch, seq, in_hsz, out_hsz = 2, 7, 32, 20
    x = jax.random.normal(kx, (batch, seq, in_hsz), jnp.float32)

    # Config 1: default (layer_norm=True, relu=True), bf16 MXU path.
    layer1 = LinearLayer(in_hsz, out_hsz, layer_norm=True, dropout=0.1, relu=True, key=k1)
    out1 = jax.block_until_ready(layer1(x))
    assert out1.shape == (batch, seq, out_hsz)
    ref1_bf16 = linear_layer_reference(x, layer1, use_matmul_dtype=True)
    ref1_f32 = linear_layer_reference(x, layer1, use_matmul_dtype=False)
    assert jnp.allclose(out1, ref1_bf16, atol=5e-3, rtol=5e-3), "mismatch vs bf16 ref (cfg1)"
    assert jnp.allclose(out1, ref1_f32, atol=5e-2, rtol=5e-2), "mismatch vs f32 ref (cfg1)"

    # Config 2: no layer-norm, no relu, tiny out size, full-f32 matmul
    # (exercises gating, out-dim padding, and the no-upcast fast path).
    layer2 = LinearLayer(in_hsz, 4, layer_norm=False, dropout=0.1, relu=False,
                         key=k2, matmul_dtype=jnp.float32)
    out2 = jax.block_until_ready(layer2(x))
    assert out2.shape == (batch, seq, 4)
    ref2 = linear_layer_reference(x, layer2, use_matmul_dtype=False)
    assert jnp.allclose(out2, ref2, atol=1e-4, rtol=1e-4), "mismatch vs reference (cfg2)"

    print("KERNEL_OK")
</pallas_src>

<mosaic_0001>
module attributes {stable_mosaic.version = 11 : i64} {
  func.func @_fused_ln_linear_kernel(%arg0: i32, %arg1: i32, %arg2: memref<16x32xf32, #tpu.memory_space<vmem>>, %arg3: memref<32x128xbf16, #tpu.memory_space<vmem>>, %arg4: memref<1x128xf32, #tpu.memory_space<vmem>>, %arg5: memref<1x32xf32, #tpu.memory_space<vmem>>, %arg6: memref<1x32xf32, #tpu.memory_space<vmem>>, %arg7: memref<16x128xf32, #tpu.memory_space<vmem>>) attributes {dimension_semantics = [#tpu.dimension_semantics<parallel>, #tpu.dimension_semantics<parallel>], iteration_bounds = array<i64: 1, 1>, scalar_prefetch = 0 : i64, scratch_operands = 0 : i64, tpu.core_type = #tpu.core_type<tc>, window_params = [{transform_indices = @transform_0, window_bounds = array<i64: 16, 32>}, {transform_indices = @transform_1, window_bounds = array<i64: 32, 128>}, {transform_indices = @transform_2, window_bounds = array<i64: 1, 128>}, {pipeline_mode = #tpu.pipeline_mode<synchronous>, transform_indices = @transform_3, window_bounds = array<i64: 1, 32>}, {pipeline_mode = #tpu.pipeline_mode<synchronous>, transform_indices = @transform_4, window_bounds = array<i64: 1, 32>}, {transform_indices = @transform_5, window_bounds = array<i64: 16, 128>}]} {
    %c0 = arith.constant 0 : index
    %c0_0 = arith.constant 0 : index
    %0 = vector.load %arg2[%c0, %c0_0] : memref<16x32xf32, #tpu.memory_space<vmem>>, vector<16x32xf32>
    %cst = arith.constant dense<0.000000e+00> : vector<16xf32>
    %1 = vector.multi_reduction <add>, %0, %cst [1] : vector<16x32xf32> to vector<16xf32>
    %2 = vector.shape_cast %1 : vector<16xf32> to vector<16x1xf32>
    %cst_1 = arith.constant 3.200000e+01 : f32
    %3 = vector.broadcast %cst_1 : f32 to vector<16x1xf32>
    %4 = arith.divf %2, %3 : vector<16x1xf32>
    %5 = vector.broadcast %4 : vector<16x1xf32> to vector<16x32xf32>
    %6 = arith.subf %0, %5 : vector<16x32xf32>
    %7 = arith.mulf %6, %6 : vector<16x32xf32>
    %cst_2 = arith.constant dense<0.000000e+00> : vector<16xf32>
    %8 = vector.multi_reduction <add>, %7, %cst_2 [1] : vector<16x32xf32> to vector<16xf32>
    %9 = vector.shape_cast %8 : vector<16xf32> to vector<16x1xf32>
    %cst_3 = arith.constant 3.200000e+01 : f32
    %10 = vector.broadcast %cst_3 : f32 to vector<16x1xf32>
    %11 = arith.divf %9, %10 : vector<16x1xf32>
    %cst_4 = arith.constant 9.99999974E-6 : f32
    %12 = vector.broadcast %cst_4 : f32 to vector<16x1xf32>
    %13 = arith.addf %11, %12 : vector<16x1xf32>
    %14 = math.rsqrt %13 : vector<16x1xf32>
    %15 = vector.broadcast %14 : vector<16x1xf32> to vector<16x32xf32>
    %16 = arith.mulf %6, %15 : vector<16x32xf32>
    %c0_5 = arith.constant 0 : index
    %c0_6 = arith.constant 0 : index
    %17 = vector.load %arg5[%c0_5, %c0_6] : memref<1x32xf32, #tpu.memory_space<vmem>>, vector<1x32xf32>
    %18 = vector.broadcast %17 : vector<1x32xf32> to vector<16x32xf32>
    %19 = arith.mulf %16, %18 : vector<16x32xf32>
    %c0_7 = arith.constant 0 : index
    %c0_8 = arith.constant 0 : index
    %20 = vector.load %arg6[%c0_7, %c0_8] : memref<1x32xf32, #tpu.memory_space<vmem>>, vector<1x32xf32>
    %21 = vector.broadcast %20 : vector<1x32xf32> to vector<16x32xf32>
    %22 = arith.addf %19, %21 : vector<16x32xf32>
    %23 = arith.truncf %22 : vector<16x32xf32> to vector<16x32xbf16>
    %c0_9 = arith.constant 0 : index
    %c0_10 = arith.constant 0 : index
    %24 = vector.load %arg3[%c0_9, %c0_10] : memref<32x128xbf16, #tpu.memory_space<vmem>>, vector<32x128xbf16>
    %cst_11 = arith.constant dense<0.000000e+00> : vector<16x128xf32>
    %25 = tpu.matmul %23, %24, %cst_11 {dimension_numbers = #tpu.dot_dimension_numbers<[1], [0], [0], [1], [0, 0, 1, 1], [], []>} : vector<16x32xbf16>, vector<32x128xbf16>, vector<16x128xf32> -> vector<16x128xf32>
    %c0_12 = arith.constant 0 : index
    %c0_13 = arith.constant 0 : index
    %26 = vector.load %arg4[%c0_12, %c0_13] : memref<1x128xf32, #tpu.memory_space<vmem>>, vector<1x128xf32>
    %27 = vector.broadcast %26 : vector<1x128xf32> to vector<16x128xf32>
    %28 = arith.addf %25, %27 : vector<16x128xf32>
    %cst_14 = arith.constant 0.000000e+00 : f32
    %29 = vector.broadcast %cst_14 : f32 to vector<16x128xf32>
    %30 = arith.maximumf %28, %29 : vector<16x128xf32>
    %c0_15 = arith.constant 0 : index
    %c0_16 = arith.constant 0 : index
    %31 = vector.load %arg7[%c0_15, %c0_16] : memref<16x128xf32, #tpu.memory_space<vmem>>, vector<16x128xf32>
    tpu.vector_store %arg7[%c0_15, %c0_16], %30 {strides = array<i32>} : memref<16x128xf32, #tpu.memory_space<vmem>>, vector<16x128xf32>,
    return
  }
  func.func @transform_0(%arg0: i32, %arg1: i32) -> (i32, i32) {
    %c0_i32 = arith.constant 0 : i32
    %c0_i32_0 = arith.constant 0 : i32
    return %arg0, %c0_i32 : i32, i32
  }
  func.func @transform_1(%arg0: i32, %arg1: i32) -> (i32, i32) {
    %c0_i32 = arith.constant 0 : i32
    %c0_i32_0 = arith.constant 0 : i32
    return %c0_i32, %arg1 : i32, i32
  }
  func.func @transform_2(%arg0: i32, %arg1: i32) -> (i32, i32) {
    %c0_i32 = arith.constant 0 : i32
    %c0_i32_0 = arith.constant 0 : i32
    return %c0_i32, %arg1 : i32, i32
  }
  func.func @transform_3(%arg0: i32, %arg1: i32) -> (i32, i32) {
    %c0_i32 = arith.constant 0 : i32
    %c0_i32_0 = arith.constant 0 : i32
    %c0_i32_1 = arith.constant 0 : i32
    return %c0_i32, %c0_i32_0 : i32, i32
  }
  func.func @transform_4(%arg0: i32, %arg1: i32) -> (i32, i32) {
    %c0_i32 = arith.constant 0 : i32
    %c0_i32_0 = arith.constant 0 : i32
    %c0_i32_1 = arith.constant 0 : i32
    return %c0_i32, %c0_i32_0 : i32, i32
  }
  func.func @transform_5(%arg0: i32, %arg1: i32) -> (i32, i32) {
    %c0_i32 = arith.constant 0 : i32
    return %arg0, %arg1 : i32, i32
  }
}

</mosaic_0001>

<bundles_post_ra>
// kernel: tpu_custom_call.1
= control target key start
LH: loop header
LB: loop body
LE: loop exit
PB: predicated region body
PF: predicated region fallthrough
CT: control target
= control target key end

     0   :  { %10 = vsyncpa [#allocation3], 0  ;;  %s387_s0 = inlined_call_operand.hbm [shape: f32[16,32], index: 0, kind: input, shape index: {}]   ;;  %s388_s1 = inlined_call_operand.hbm [shape: bf16[32,128], index: 1, kind: input, shape index: {}]   ;;  %s389_s2 = inlined_call_operand.vmem [shape: f32[1,128], index: 2, kind: input, shape index: {}]   ;;  %s390_s3 = inlined_call_operand.vmem [shape: f32[1,32], index: 3, kind: input, shape index: {}]   ;;  %s391_s4 = inlined_call_operand.vmem [shape: f32[1,32], index: 4, kind: input, shape index: {}]   ;;  %s392_s5 = inlined_call_operand.hbm [shape: f32[16,128], index: 5, kind: output, shape index: {}]  }
   0x1   :  { %11 = vsyncpa [#allocation6], 0 }
   0x2   :  { %12 = vsyncpa [#allocation4], 0  ;;  %s292_s18 = smov [#allocation2]   ;;  %s220_s22 = scalar_lea.hbm %s387_s0, 256 }
   0x3   :  { %s18_s19 = sshll.u32 %s292_s18, 4  ;;  %p221_p0 = scmp.ne.s32.totalorder %s387_s0, %s220_s22  ;;  %s19_s19 = int_to_ptr.vmem [resolvable:$true] %s18_s19 }
   0x4   :  { %p224_p1 = scmp.lt.u32.totalorder %s220_s22, %s387_s0 }
   0x6   :  { %p226_p2 = pnand %p224_p1, %p221_p0 }
   0x8   :  { %229 = shalt.err (!%p226_p2)
}
   0x9   :  { %s230_s27 = scalar_lea.vmem %s19_s19, 256  ;;  %p235_p4 = scmp.lt.s32.totalorder %s19_s19, %s19_s19 }
   0xa   :  { %p231_p3 = scmp.ne.s32.totalorder %s19_s19, %s230_s27  ;;  %p236_p5 = scmp.lt.s32.totalorder %s230_s27, %s230_s27 }
   0xc   :  { %p237_p6 = por %p236_p5, %p235_p4 }
   0xe   :  { %p238_p7 = pnand %p237_p6, %p231_p3 }
  0x10   :  { %241 = shalt.err (!%p238_p7)
}
  0x11   :  { %s293_s28 = smov 128   ;;  %s294_s29 = smov 8  }
  0x12   :  { %24 = dma.hbm_to_vmem [thread:$0]  %s387_s0, 256, %s19_s19, [#allocation3], %s293_s28, %s293_s28, %s294_s29  }
  0x13   :  { %s295_s7 = smov [#allocation5]   ;;  %s242_s11 = scalar_lea.hbm %s388_s1, 256 }
  0x14   :  { %s30_s8 = sshll.u32 %s295_s7, 4  ;;  %p243_p8 = scmp.ne.s32.totalorder %s388_s1, %s242_s11  ;;  %s31_s8 = int_to_ptr.vmem [resolvable:$true] %s30_s8 }
  0x15   :  { %p246_p9 = scmp.lt.u32.totalorder %s242_s11, %s388_s1 }
  0x17   :  { %p248_p10 = pnand %p246_p9, %p243_p8 }
  0x19   :  { %251 = shalt.err (!%p248_p10)
}
  0x1a   :  { %s252_s16 = scalar_lea.vmem %s31_s8, 256  ;;  %p257_p12 = scmp.lt.s32.totalorder %s31_s8, %s31_s8 }
  0x1b   :  { %p253_p11 = scmp.ne.s32.totalorder %s31_s8, %s252_s16  ;;  %p258_p13 = scmp.lt.s32.totalorder %s252_s16, %s252_s16 }
  0x1d   :  { %p259_p0 = por %p258_p13, %p257_p12 }
  0x1f   :  { %p260_p1 = pnand %p259_p0, %p253_p11 }
  0x21   :  { %263 = shalt.err (!%p260_p1)
}
  0x22   :  { %s296_s0 = smov 64   ;;  %s297_s17 = smov 4  }
  0x23   :  { %36 = dma.hbm_to_vmem [thread:$0]  %s388_s1, 256, %s31_s8, [#allocation6], %s296_s0, %s296_s0, %s297_s17  }
  0x24   :  { %286 = dma.done.wait [#allocation3], 256  }
  0x25   :  { %287 = vsyncadd [#allocation3], 4294967040 }
  0x26   :  { %288 = dma.done.wait [#allocation6], 256  }
  0x27   :  { %289 = vsyncadd [#allocation6], 4294967040  ;;  %vm52_vm0 = vcmask 261120   ;;  %v50_v0 = vld [vmem:[#allocation2] sm:$0xff]  ;;  %v51_v1 = vld [vmem:[#allocation2 + $0x8] sm:$0xff]  ;;  %v298_v15 = vmov 0.0  }
  0x28   :  { %v53_v2 = vsel %vm52_vm0, %v50_v0, 0.0  ;;  %v56_v3 = vsel %vm52_vm0, %v51_v1, 0.0  ;;  %v214_v14 = vld [vmem:[#allocation5] sm:$0xff]   ;;  %197 = vmatprep.subr.bf16.mxu0 %v298_v15  ;;  %v215_v16 = vld [vmem:[#allocation5 + $0x8] sm:$0xff]   ;;  %vm299_vm1 = vmmov 0  }
  0x29   :  { %54 = vadd.xlane.f32.xlu0 %v53_v2  ;;  %198 = vmatpush3.bf16.msra.mxu0 %v214_v14  ;;  %v188_v25 = vld [vmem:[%s390_s3] ss:$0 sm:$0xff]  ;;  %s300_s3 = smov [#allocation7]  }
  0x2a   :  { %201 = vmatprep.mubr.msk.bf16.mxu0 %vm299_vm1, %v298_v15  ;;  %199 = vmatprep.subr.bf16.mxu0 %v298_v15  ;;  %v189_v29 = vld [vmem:[%s391_s4] ss:$0 sm:$0xff]  ;;  %s175_s25 = sshll.u32 %s300_s3, 4  ;;  %s176_s25 = int_to_ptr.vmem [resolvable:$true] %s175_s25 }
  0x2b   :  { %v190_v34 = vld [vmem:[%s389_s2] ss:$0 sm:$0xff]  ;;  %s264_s4 = scalar_lea.vmem %s176_s25, 256  ;;  %p269_p3 = scmp.lt.s32.totalorder %s176_s25, %s176_s25 }
  0x2c   :  { %p265_p2 = scmp.ne.s32.totalorder %s176_s25, %s264_s4  ;;  %p270_p4 = scmp.lt.s32.totalorder %s264_s4, %s264_s4 }
  0x2d   :  { %57 = vadd.xlane.f32.xlu0 %v56_v3  ;;  %200 = vmatpush3.bf16.msra.mxu0 %v215_v16 }
  0x2e   :  { %p271_p5 = por %p270_p4, %p269_p3 }
  0x30   :  { %p272_p6 = pnand %p271_p5, %p265_p2 }
  0xb6   :  { %v55_v4 = vpop.xlane.xlu0 %54 }
  0xb7   :  { %v60_v5 = vmul.f32 0.03125, %v55_v4 }
  0xb9   :  { %v62_v6 = vsub.f32 %v50_v0, %v60_v5 }
  0xba   :  { %v58_v7 = vpop.xlane.xlu0 %57 }
  0xbb   :  { %v61_v8 = vmul.f32 0.03125, %v58_v7  ;;  %v64_v9 = vmul.f32 %v62_v6, %v62_v6 }
  0xbd   :  { %v63_v10 = vsub.f32 %v51_v1, %v61_v8  ;;  %v66_v11 = vsel %vm52_vm0, %v64_v9, 0.0 }
  0xbe   :  { %67 = vadd.xlane.f32.xlu1 %v66_v11 }
  0xbf   :  { %v65_v12 = vmul.f32 %v63_v10, %v63_v10 }
  0xc1   :  { %v69_v13 = vsel %vm52_vm0, %v65_v12, 0.0 }
  0xc2   :  { %70 = vadd.xlane.f32.xlu1 %v69_v13 }
 0x14b   :  { %v68_v17 = vpop.xlane.xlu1 %67 }
 0x14c   :  { %v72_v18 = vmul.f32 0.03125, %v68_v17 }
 0x14e   :  { %v74_v19 = vadd.f32 1e-05, %v72_v18 }
 0x14f   :  { %v71_v20 = vpop.xlane.xlu1 %70 }
 0x150   :  { %216 = vrsqrt.f32 %v74_v19  ;;  %v73_v21 = vmul.f32 0.03125, %v71_v20 }
 0x152   :  { %v75_v22 = vadd.f32 1e-05, %v73_v21 }
 0x154   :  { %218 = vrsqrt.f32 %v75_v22 }
 0x15a   :  { %v217_v23 = vpop.eup %216 }
 0x15b   :  { %v78_v24 = vmul.f32 %v217_v23, %v62_v6 }
 0x15d   :  { %v87_v28 = vmul.f32 %v188_v25, %v78_v24 }
 0x15e   :  { %v219_v26 = vpop.eup %218 }
 0x15f   :  { %v79_v27 = vmul.f32 %v219_v26, %v63_v10  ;;  %v96_v31 = vadd.f32 %v189_v29, %v87_v28 }
 0x161   :  { %v88_v30 = vmul.f32 %v188_v25, %v79_v27 }
 0x163   :  { %v97_v32 = vadd.f32 %v189_v29, %v88_v30 }
 0x165   :  { %v98_v33 = vpack.c.bf16 %v97_v32, %v96_v31 }
 0x167   :  { %202 = vmatmul.mubr.msk.bf16.vlgmr.msra.gmra.mrb[0].mxu0 %vm52_vm0, %v98_v33 }
 0x23a   :  { %v159_v35 = vpop.f32.mrb[0].mxu0 }
 0x23b   :  { %v160_v36 = vadd.f32 %v190_v34, %v159_v35  ;;  %v203_v37 = vpop.f32.mrb[1].mxu0 }
 0x23c   :  { %v162_v38 = vpop.f32.mrb[2].mxu0 }
 0x23d   :  { %v166_v39 = vmax.f32 %v160_v36, 0.0  ;;  %v163_v40 = vadd.f32 %v190_v34, %v162_v38  ;;  %v204_v41 = vpop.f32.mrb[3].mxu0 }
 0x23f   :  { %168 = vst [vmem:[#allocation7] sm:$0xff] %v166_v39  ;;  %v167_v42 = vmax.f32 %v163_v40, 0.0 }
 0x241   :  { %169 = vst [vmem:[#allocation7 + $0x8] sm:$0xff] %v167_v42 }
 0x242   :  { %275 = shalt.err (!%p272_p6)
}
 0x243   :  { %s276_s27 = scalar_lea.hbm %s392_s5, 256 }
 0x244   :  { %p277_p7 = scmp.ne.s32.totalorder %s392_s5, %s276_s27  ;;  %p280_p8 = scmp.lt.u32.totalorder %s276_s27, %s392_s5 }
 0x246   :  { %p282_p9 = pnand %p280_p8, %p277_p7 }
 0x248   :  { %285 = shalt.err (!%p282_p9)
}
 0x249   :  { %181 = dma.vmem_to_hbm [thread:$0]  %s176_s25, 256, %s392_s5, [#allocation4], %s293_s28, %s293_s28, %s294_s29  }
 0x24a   :  { %290 = dma.done.wait [#allocation4], 256  }
 0x24b   :  { %291 = vsyncadd [#allocation4], 4294967040 }
 0x24c   :  { %185 = vsyncpa [#allocation3], 1 }
 0x24d   :  { %186 = vsyncpa [#allocation6], 1 }
 0x24e   :  { %187 = vsyncpa [#allocation4], 1 }

</bundles_post_ra>
